<compile_context>
chip_gen: v6e
topology: v6e:2x2x1
jax: 0.10.0
libtpu: 0.0.40
codegen_flags: <defaults>
</compile_context>

<pallas_src>
import functools

import jax
import jax.numpy as jnp
from jax.experimental import pallas as pl
from jax.experimental.pallas import tpu as pltpu


# --------------------------------------------------------------------------
# Kernel
# --------------------------------------------------------------------------
def _dc_focal_kernel(logits_ref, tgt_ref, tp_ref, ps_ref, os_ref, foc_ref, *,
                     num_classes, n_valid, tile_n, tiles_per_split,
                     focal_smooth, gamma, needs_mask):
    # logits_ref block: (1, C, TILE_N) native dtype
    # tgt_ref    block: (1, 1, TILE_N) int8/int32 class ids
    # outputs (per (batch, split) accumulators, resident across the tile axis):
    #   tp_ref/ps_ref/os_ref: (1, 1, C, 1) f32 ; foc_ref: (1, 1, 1, 1) f32
    j = pl.program_id(2)

    @pl.when(j == 0)
    def _init():
        tp_ref[...] = jnp.zeros_like(tp_ref)
        ps_ref[...] = jnp.zeros_like(ps_ref)
        os_ref[...] = jnp.zeros_like(os_ref)
        foc_ref[...] = jnp.zeros_like(foc_ref)

    C = num_classes
    x = logits_ref[0].astype(jnp.float32)          # (C, TILE_N), cast after DMA
    tgt = tgt_ref[0].astype(jnp.int32)             # (1, TILE_N)

    valid = None
    if needs_mask:
        # pixels past the true spatial extent (partial last block or clamped
        # overflow tiles of the core split) must not contribute.
        s = pl.program_id(1)
        base = (s * tiles_per_split + j) * tile_n
        lane = jax.lax.broadcasted_iota(jnp.int32, (1, tile_n), 1)
        valid = (lane + base) < n_valid            # (1, TILE_N) bool
        x = jnp.where(valid, x, 0.0)               # keep softmax finite

    # softmax over channels; single approximate reciprocal per pixel (EUP)
    m = jnp.max(x, axis=0, keepdims=True)
    e = jnp.exp(x - m)
    inv = pl.reciprocal(jnp.sum(e, axis=0, keepdims=True), approx=True)
    p = e * inv                                    # (C, TILE_N) probabilities

    # one-hot handled as a boolean match (no f32 one-hot tensor / multiply)
    cls = jax.lax.broadcasted_iota(jnp.int32, (C, tile_n), 0)
    match = cls == tgt                             # (C, TILE_N) bool
    if needs_mask:
        match = jnp.logical_and(match, valid)
    prod = jnp.where(match, p, 0.0)                # p at the target class only
    p_target = jnp.sum(prod, axis=0, keepdims=True)           # (1, TILE_N)

    p_masked = jnp.where(valid, p, 0.0) if needs_mask else p

    # soft-dice statistics: tp, sum(p), sum(onehot) per class; fp/fn derived
    # algebraically in the O(B*C) finalization outside the kernel.
    tp_ref[0, 0] += jnp.sum(prod, axis=1, keepdims=True)       # (C, 1)
    ps_ref[0, 0] += jnp.sum(p_masked, axis=1, keepdims=True)   # (C, 1)
    os_ref[0, 0] += jnp.sum(match.astype(jnp.float32), axis=1, keepdims=True)

    # focal term: pt = lo + (hi - lo) * p_target + smooth  (since sum_c p == 1)
    lo = focal_smooth / (C - 1.0)
    hi = 1.0 - focal_smooth
    pt = lo + (hi - lo) * p_target + focal_smooth              # (1, TILE_N)
    logpt = jnp.log(pt)
    om = 1.0 - pt
    mod = om * om if gamma == 2.0 else jnp.power(om, gamma)
    foc = -mod * logpt
    if needs_mask:
        foc = jnp.where(valid, foc, 0.0)
    foc_ref[0, 0] += jnp.sum(foc, axis=1, keepdims=True)       # (1, 1)


# --------------------------------------------------------------------------
# Tile sizing from a VMEM footprint budget
# --------------------------------------------------------------------------
def _vmem_capacity_bytes(default=64 * 2**20):
    """Physical VMEM if queryable; conservative 64 MiB (v7x) otherwise."""
    try:
        info = pltpu.get_tpu_info()
        for attr in ("vmem_capacity_bytes", "vmem_size_bytes", "vmem_bytes"):
            v = getattr(info, attr, None)
            if v:
                return int(v)
    except Exception:
        pass
    return default


def _per_pixel_vmem_bytes(C, logits_itemsize):
    # logits tile (sublane-padded) + target tile (padded packed tile) ...
    in_px = max(C * logits_itemsize, 32) + 32
    # ... double-buffered inputs + ~6 live f32 (C_pad, TILE_N) temporaries
    return 2 * in_px + 6 * max(C, 8) * 4


def _choose_tile_n(N, C, logits_itemsize, max_tile_n):
    """Largest lane-aligned spatial tile that fits the VMEM budget."""
    if N <= 128:
        return N                      # full-extent block (always legal)
    budget = max(8 * 2**20, min(_vmem_capacity_bytes() // 4, 32 * 2**20))
    t = budget // _per_pixel_vmem_bytes(C, logits_itemsize)
    t = min(t, max_tile_n, 131072, N)
    t = (t // 128) * 128
    return max(t, 128)


# --------------------------------------------------------------------------
# Wrapper
# --------------------------------------------------------------------------
def dc_and_focal_loss(net_output, target, *,
                      weight_focal=1.0, weight_dice=1.0,
                      dice_smooth=1e-5, do_bg=False,
                      focal_smooth=1e-5, gamma=2.0,
                      max_tile_n=131072, n_core_splits=2):
    B, C, H, W = net_output.shape
    assert C >= 2, ("need >= 2 classes: focal smoothing divides by C-1 and "
                    "do_bg=False drops the background class")
    N = H * W

    TILE_N = _choose_tile_n(N, C, net_output.dtype.itemsize, max_tile_n)
    n_tiles = pl.cdiv(N, TILE_N)
    S = max(1, min(int(n_core_splits), n_tiles))      # spatial core split
    tiles_per_split = pl.cdiv(n_tiles, S)
    needs_mask = (S * tiles_per_split * TILE_N != N)

    # logits keep their native dtype in HBM; targets shipped as 1-byte ids.
    logits = net_output.reshape(B, C, N)
    tgt_dtype = jnp.int8 if C <= 127 else jnp.int32
    tgt = target.reshape(B, 1, N).astype(tgt_dtype)

    kernel = functools.partial(
        _dc_focal_kernel, num_classes=C, n_valid=N, tile_n=TILE_N,
        tiles_per_split=tiles_per_split, focal_smooth=float(focal_smooth),
        gamma=float(gamma), needs_mask=needs_mask)

    out_shape = (
        jax.ShapeDtypeStruct((B, S, C, 1), jnp.float32),   # tp
        jax.ShapeDtypeStruct((B, S, C, 1), jnp.float32),   # sum(p)      -> fp
        jax.ShapeDtypeStruct((B, S, C, 1), jnp.float32),   # sum(onehot) -> fn
        jax.ShapeDtypeStruct((B, S, 1, 1), jnp.float32),   # focal partial sum
    )

    last_blk = n_tiles - 1   # clamp overflow tiles of the core split

    def logits_map(b, s, j):
        return (b, 0, jnp.minimum(s * tiles_per_split + j, last_blk))

    def tgt_map(b, s, j):
        return (b, 0, jnp.minimum(s * tiles_per_split + j, last_blk))

    grid_spec = pltpu.PrefetchScalarGridSpec(
        num_scalar_prefetch=0,
        grid=(B, S, tiles_per_split),
        in_specs=[
            pl.BlockSpec((1, C, TILE_N), logits_map),
            pl.BlockSpec((1, 1, TILE_N), tgt_map),
        ],
        out_specs=[
            pl.BlockSpec((1, 1, C, 1), lambda b, s, j: (b, s, 0, 0)),
            pl.BlockSpec((1, 1, C, 1), lambda b, s, j: (b, s, 0, 0)),
            pl.BlockSpec((1, 1, C, 1), lambda b, s, j: (b, s, 0, 0)),
            pl.BlockSpec((1, 1, 1, 1), lambda b, s, j: (b, s, 0, 0)),
        ],
    )

    # VMEM budget sized to the actual tile footprint (safe on 64 MiB v7x).
    cap = _vmem_capacity_bytes()
    need = _per_pixel_vmem_bytes(C, net_output.dtype.itemsize) * TILE_N
    vmem_limit = int(min(cap * 3 // 4, max(32 * 2**20, need + 4 * 2**20)))

    tp, psum, osum, foc = pl.pallas_call(
        kernel,
        out_shape=out_shape,
        grid_spec=grid_spec,
        compiler_params=pltpu.CompilerParams(
            dimension_semantics=("parallel", "parallel", "arbitrary"),
            vmem_limit_bytes=vmem_limit),
    )(logits, tgt)

    # ---- tiny O(B*C) finalization in plain JAX ----
    tp = jnp.sum(tp[..., 0], axis=1)                 # (B, C)
    fp = jnp.sum(psum[..., 0], axis=1) - tp          # sum(p)      - tp
    fn = jnp.sum(osum[..., 0], axis=1) - tp          # sum(onehot) - tp

    # SoftDiceLoss finalization (batch_dice=False -> per (b, c) dice)
    nominator = 2.0 * tp + dice_smooth
    denominator = jnp.clip(2.0 * tp + fp + fn + dice_smooth, 1e-8)
    dc = nominator / denominator
    if not do_bg:
        dc = dc[:, 1:]
    dc_loss = -jnp.mean(dc)

    # FocalLoss finalization (size_average=True -> mean over all real pixels)
    focal_loss = jnp.sum(foc) / (B * N)

    # TODO(synk): ignore_label masking not implemented (module default is None).
    return weight_focal * focal_loss + weight_dice * dc_loss


# --------------------------------------------------------------------------
# Pure-JAX reference mirroring the PyTorch forward, for validation
# --------------------------------------------------------------------------
def _reference_loss(net_output, target, *,
                    dice_smooth=1e-5, do_bg=False, focal_smooth=1e-5):
    B, C, H, W = net_output.shape
    p = jax.nn.softmax(net_output.astype(jnp.float32), axis=1)
    t = target[:, 0].astype(jnp.int32)
    onehot = jax.nn.one_hot(t, C, axis=1, dtype=jnp.float32)   # (B, C, H, W)

    axes = (2, 3)
    tp = jnp.sum(p * onehot, axis=axes)
    fp = jnp.sum(p * (1.0 - onehot), axis=axes)
    fn = jnp.sum((1.0 - p) * onehot, axis=axes)
    dc = (2.0 * tp + dice_smooth) / jnp.clip(2.0 * tp + fp + fn + dice_smooth, 1e-8)
    if not do_bg:
        dc = dc[:, 1:]
    dc_loss = -jnp.mean(dc)

    oh = jnp.clip(onehot, focal_smooth / (C - 1), 1.0 - focal_smooth)
    pt = jnp.sum(oh * p, axis=1) + focal_smooth
    focal = jnp.mean(-jnp.square(1.0 - pt) * jnp.log(pt))
    return focal + dc_loss


if __name__ == "__main__":
    key = jax.random.PRNGKey(0)
    ks = jax.random.split(key, 8)

    def check(loss, ref, tag, rtol=2e-3, atol=5e-4):
        loss = jax.block_until_ready(loss)
        ref = jax.block_until_ready(ref)
        assert jnp.isfinite(loss), f"non-finite loss ({tag})"
        assert jnp.allclose(loss, ref, rtol=rtol, atol=atol), (tag, loss, ref)

    B, C = 2, 4

    # 1) small single-tile fast path (no masking, no split)
    x1 = jax.random.normal(ks[0], (B, C, 16, 16), dtype=jnp.float32)
    t1 = jax.random.randint(ks[1], (B, 1, 16, 16), 0, C, dtype=jnp.int32)
    check(dc_and_focal_loss(x1, t1), _reference_loss(x1, t1), "single-tile")

    # 2) multi-tile accumulation + core split with a fully masked overflow tile
    #    (N = 384, TILE_N forced to 128 -> 3 tiles split over 2 halves)
    x2 = jax.random.normal(ks[2], (B, C, 16, 24), dtype=jnp.float32)
    t2 = jax.random.randint(ks[3], (B, 1, 16, 24), 0, C, dtype=jnp.int32)
    check(dc_and_focal_loss(x2, t2, max_tile_n=128),
          _reference_loss(x2, t2), "multi-tile")

    # 3) non-128-aligned spatial extent (partial last block masking)
    x3 = jax.random.normal(ks[4], (B, C, 20, 20), dtype=jnp.float32)
    t3 = jax.random.randint(ks[5], (B, 1, 20, 20), 0, C, dtype=jnp.int32)
    check(dc_and_focal_loss(x3, t3), _reference_loss(x3, t3), "unaligned-N")

    # 4) bf16 logits stay bf16 in HBM (cast to f32 after DMA inside the kernel)
    x4 = jax.random.normal(ks[6], (B, C, 32, 32), dtype=jnp.bfloat16)
    t4 = jax.random.randint(ks[7], (B, 1, 32, 32), 0, C, dtype=jnp.int32)
    check(dc_and_focal_loss(x4, t4), _reference_loss(x4, t4), "bf16-logits")

    print("KERNEL_OK")
</pallas_src>

<mosaic_0001>
module attributes {stable_mosaic.version = 11 : i64} {
  func.func @_dc_focal_kernel(%arg0: i32, %arg1: i32, %arg2: i32, %arg3: memref<1x4x256xf32, #tpu.memory_space<vmem>>, %arg4: memref<1x1x256xi8, #tpu.memory_space<vmem>>, %arg5: memref<1x1x4x1xf32, #tpu.memory_space<vmem>>, %arg6: memref<1x1x4x1xf32, #tpu.memory_space<vmem>>, %arg7: memref<1x1x4x1xf32, #tpu.memory_space<vmem>>, %arg8: memref<1x1x1x1xf32, #tpu.memory_space<vmem>>) attributes {dimension_semantics = [#tpu.dimension_semantics<parallel>, #tpu.dimension_semantics<parallel>, #tpu.dimension_semantics<arbitrary>], iteration_bounds = array<i64: 2, 1, 1>, scalar_prefetch = 0 : i64, scratch_operands = 0 : i64, tpu.core_type = #tpu.core_type<tc>, window_params = [{transform_indices = @transform_0, window_bounds = array<i64: 1, 4, 256>}, {transform_indices = @transform_1, window_bounds = array<i64: 1, 1, 256>}, {transform_indices = @transform_2, window_bounds = array<i64: 1, 1, 4, 1>}, {transform_indices = @transform_3, window_bounds = array<i64: 1, 1, 4, 1>}, {transform_indices = @transform_4, window_bounds = array<i64: 1, 1, 4, 1>}, {transform_indices = @transform_5, window_bounds = array<i64: 1, 1, 1, 1>}]} {
    %c0_i32 = arith.constant 0 : i32
    %0 = arith.cmpi eq, %arg2, %c0_i32 : i32
    %1 = arith.extui %0 : i1 to i32
    %c0_i32_0 = arith.constant 0 : i32
    %2 = arith.cmpi ne, %1, %c0_i32_0 : i32
    scf.if %2 {
      %cst_50 = arith.constant 0.000000e+00 : f32
      %72 = vector.broadcast %cst_50 : f32 to vector<1x1x4x1xf32>
      %c0_51 = arith.constant 0 : index
      %c0_52 = arith.constant 0 : index
      %c0_53 = arith.constant 0 : index
      %c0_54 = arith.constant 0 : index
      %73 = vector.load %arg5[%c0_51, %c0_52, %c0_53, %c0_54] : memref<1x1x4x1xf32, #tpu.memory_space<vmem>>, vector<1x1x4x1xf32>
      tpu.vector_store %arg5[%c0_51, %c0_52, %c0_53, %c0_54], %72 {strides = array<i32>} : memref<1x1x4x1xf32, #tpu.memory_space<vmem>>, vector<1x1x4x1xf32>,
      %cst_55 = arith.constant 0.000000e+00 : f32
      %74 = vector.broadcast %cst_55 : f32 to vector<1x1x4x1xf32>
      %c0_56 = arith.constant 0 : index
      %c0_57 = arith.constant 0 : index
      %c0_58 = arith.constant 0 : index
      %c0_59 = arith.constant 0 : index
      %75 = vector.load %arg6[%c0_56, %c0_57, %c0_58, %c0_59] : memref<1x1x4x1xf32, #tpu.memory_space<vmem>>, vector<1x1x4x1xf32>
      tpu.vector_store %arg6[%c0_56, %c0_57, %c0_58, %c0_59], %74 {strides = array<i32>} : memref<1x1x4x1xf32, #tpu.memory_space<vmem>>, vector<1x1x4x1xf32>,
      %cst_60 = arith.constant 0.000000e+00 : f32
      %76 = vector.broadcast %cst_60 : f32 to vector<1x1x4x1xf32>
      %c0_61 = arith.constant 0 : index
      %c0_62 = arith.constant 0 : index
      %c0_63 = arith.constant 0 : index
      %c0_64 = arith.constant 0 : index
      %77 = vector.load %arg7[%c0_61, %c0_62, %c0_63, %c0_64] : memref<1x1x4x1xf32, #tpu.memory_space<vmem>>, vector<1x1x4x1xf32>
      tpu.vector_store %arg7[%c0_61, %c0_62, %c0_63, %c0_64], %76 {strides = array<i32>} : memref<1x1x4x1xf32, #tpu.memory_space<vmem>>, vector<1x1x4x1xf32>,
      %cst_65 = arith.constant 0.000000e+00 : f32
      %78 = vector.broadcast %cst_65 : f32 to vector<1x1x1x1xf32>
      %c0_66 = arith.constant 0 : index
      %c0_67 = arith.constant 0 : index
      %c0_68 = arith.constant 0 : index
      %c0_69 = arith.constant 0 : index
      %79 = vector.load %arg8[%c0_66, %c0_67, %c0_68, %c0_69] : memref<1x1x1x1xf32, #tpu.memory_space<vmem>>, vector<1x1x1x1xf32>
      tpu.vector_store %arg8[%c0_66, %c0_67, %c0_68, %c0_69], %78 {strides = array<i32>} : memref<1x1x1x1xf32, #tpu.memory_space<vmem>>, vector<1x1x1x1xf32>,
    } else {
    }
    %c0 = arith.constant 0 : index
    %c0_1 = arith.constant 0 : index
    %c0_2 = arith.constant 0 : index
    %3 = vector.load %arg3[%c0, %c0_1, %c0_2] : memref<1x4x256xf32, #tpu.memory_space<vmem>>, vector<1x4x256xf32>
    %4 = vector.shape_cast %3 : vector<1x4x256xf32> to vector<4x256xf32>
    %c0_3 = arith.constant 0 : index
    %c0_4 = arith.constant 0 : index
    %c0_5 = arith.constant 0 : index
    %5 = vector.load %arg4[%c0_3, %c0_4, %c0_5] : memref<1x1x256xi8, #tpu.memory_space<vmem>>, vector<1x1x256xi8>
    %6 = vector.shape_cast %5 : vector<1x1x256xi8> to vector<1x256xi8>
    %7 = arith.extsi %6 : vector<1x256xi8> to vector<1x256xi32>
    %cst = arith.constant dense<0xFF800000> : vector<256xf32>
    %8 = vector.multi_reduction <maximumf>, %4, %cst [0] : vector<4x256xf32> to vector<256xf32>
    %9 = vector.shape_cast %8 : vector<256xf32> to vector<1x256xf32>
    %10 = vector.broadcast %9 : vector<1x256xf32> to vector<4x256xf32>
    %11 = arith.subf %4, %10 : vector<4x256xf32>
    %12 = math.exp %11 : vector<4x256xf32>
    %cst_6 = arith.constant dense<0.000000e+00> : vector<256xf32>
    %13 = vector.multi_reduction <add>, %12, %cst_6 [0] : vector<4x256xf32> to vector<256xf32>
    %14 = vector.shape_cast %13 : vector<256xf32> to vector<1x256xf32>
    %15 = tpu.reciprocal %14 {approx = true} : vector<1x256xf32> -> vector<1x256xf32>
    %16 = vector.broadcast %15 : vector<1x256xf32> to vector<4x256xf32>
    %17 = arith.mulf %12, %16 : vector<4x256xf32>
    %18 = tpu.iota {dimensions = array<i32: 0>} : vector<4x256xi32>
    %19 = vector.broadcast %7 : vector<1x256xi32> to vector<4x256xi32>
    %20 = arith.cmpi eq, %18, %19 : vector<4x256xi32>
    %cst_7 = arith.constant 0.000000e+00 : f32
    %21 = vector.broadcast %cst_7 : f32 to vector<4x256xf32>
    %22 = arith.select %20, %17, %21 : vector<4x256xi1>, vector<4x256xf32>
    %cst_8 = arith.constant dense<0.000000e+00> : vector<256xf32>
    %23 = vector.multi_reduction <add>, %22, %cst_8 [0] : vector<4x256xf32> to vector<256xf32>
    %24 = vector.shape_cast %23 : vector<256xf32> to vector<1x256xf32>
    %c0_9 = arith.constant 0 : index
    %c0_10 = arith.constant 0 : index
    %c0_11 = arith.constant 0 : index
    %c0_12 = arith.constant 0 : index
    %25 = vector.load %arg5[%c0_9, %c0_10, %c0_11, %c0_12] : memref<1x1x4x1xf32, #tpu.memory_space<vmem>>, vector<1x1x4x1xf32>
    %26 = vector.shape_cast %25 : vector<1x1x4x1xf32> to vector<4x1xf32>
    %cst_13 = arith.constant dense<0.000000e+00> : vector<4xf32>
    %27 = vector.multi_reduction <add>, %22, %cst_13 [1] : vector<4x256xf32> to vector<4xf32>
    %28 = vector.shape_cast %27 : vector<4xf32> to vector<4x1xf32>
    %29 = arith.addf %26, %28 : vector<4x1xf32>
    %c0_14 = arith.constant 0 : index
    %c0_15 = arith.constant 0 : index
    %c0_16 = arith.constant 0 : index
    %c0_17 = arith.constant 0 : index
    %30 = vector.load %arg5[%c0_14, %c0_15, %c0_16, %c0_17] : memref<1x1x4x1xf32, #tpu.memory_space<vmem>>, vector<1x1x4x1xf32>
    %31 = vector.shape_cast %30 : vector<1x1x4x1xf32> to vector<4x1xf32>
    %32 = vector.shape_cast %29 : vector<4x1xf32> to vector<1x1x4x1xf32>
    tpu.vector_store %arg5[%c0_14, %c0_15, %c0_16, %c0_17], %32 {strides = array<i32>} : memref<1x1x4x1xf32, #tpu.memory_space<vmem>>, vector<1x1x4x1xf32>,
    %c0_18 = arith.constant 0 : index
    %c0_19 = arith.constant 0 : index
    %c0_20 = arith.constant 0 : index
    %c0_21 = arith.constant 0 : index
    %33 = vector.load %arg6[%c0_18, %c0_19, %c0_20, %c0_21] : memref<1x1x4x1xf32, #tpu.memory_space<vmem>>, vector<1x1x4x1xf32>
    %34 = vector.shape_cast %33 : vector<1x1x4x1xf32> to vector<4x1xf32>
    %cst_22 = arith.constant dense<0.000000e+00> : vector<4xf32>
    %35 = vector.multi_reduction <add>, %17, %cst_22 [1] : vector<4x256xf32> to vector<4xf32>
    %36 = vector.shape_cast %35 : vector<4xf32> to vector<4x1xf32>
    %37 = arith.addf %34, %36 : vector<4x1xf32>
    %c0_23 = arith.constant 0 : index
    %c0_24 = arith.constant 0 : index
    %c0_25 = arith.constant 0 : index
    %c0_26 = arith.constant 0 : index
    %38 = vector.load %arg6[%c0_23, %c0_24, %c0_25, %c0_26] : memref<1x1x4x1xf32, #tpu.memory_space<vmem>>, vector<1x1x4x1xf32>
    %39 = vector.shape_cast %38 : vector<1x1x4x1xf32> to vector<4x1xf32>
    %40 = vector.shape_cast %37 : vector<4x1xf32> to vector<1x1x4x1xf32>
    tpu.vector_store %arg6[%c0_23, %c0_24, %c0_25, %c0_26], %40 {strides = array<i32>} : memref<1x1x4x1xf32, #tpu.memory_space<vmem>>, vector<1x1x4x1xf32>,
    %c0_27 = arith.constant 0 : index
    %c0_28 = arith.constant 0 : index
    %c0_29 = arith.constant 0 : index
    %c0_30 = arith.constant 0 : index
    %41 = vector.load %arg7[%c0_27, %c0_28, %c0_29, %c0_30] : memref<1x1x4x1xf32, #tpu.memory_space<vmem>>, vector<1x1x4x1xf32>
    %42 = vector.shape_cast %41 : vector<1x1x4x1xf32> to vector<4x1xf32>
    %43 = arith.extui %20 : vector<4x256xi1> to vector<4x256xi32>
    %44 = arith.sitofp %43 : vector<4x256xi32> to vector<4x256xf32>
    %cst_31 = arith.constant dense<0.000000e+00> : vector<4xf32>
    %45 = vector.multi_reduction <add>, %44, %cst_31 [1] : vector<4x256xf32> to vector<4xf32>
    %46 = vector.shape_cast %45 : vector<4xf32> to vector<4x1xf32>
    %47 = arith.addf %42, %46 : vector<4x1xf32>
    %c0_32 = arith.constant 0 : index
    %c0_33 = arith.constant 0 : index
    %c0_34 = arith.constant 0 : index
    %c0_35 = arith.constant 0 : index
    %48 = vector.load %arg7[%c0_32, %c0_33, %c0_34, %c0_35] : memref<1x1x4x1xf32, #tpu.memory_space<vmem>>, vector<1x1x4x1xf32>
    %49 = vector.shape_cast %48 : vector<1x1x4x1xf32> to vector<4x1xf32>
    %50 = vector.shape_cast %47 : vector<4x1xf32> to vector<1x1x4x1xf32>
    tpu.vector_store %arg7[%c0_32, %c0_33, %c0_34, %c0_35], %50 {strides = array<i32>} : memref<1x1x4x1xf32, #tpu.memory_space<vmem>>, vector<1x1x4x1xf32>,
    %cst_36 = arith.constant 0.999986648 : f32
    %51 = vector.broadcast %cst_36 : f32 to vector<1x256xf32>
    %52 = arith.mulf %51, %24 : vector<1x256xf32>
    %cst_37 = arith.constant 3.33333332E-6 : f32
    %53 = vector.broadcast %cst_37 : f32 to vector<1x256xf32>
    %54 = arith.addf %53, %52 : vector<1x256xf32>
    %cst_38 = arith.constant 9.99999974E-6 : f32
    %55 = vector.broadcast %cst_38 : f32 to vector<1x256xf32>
    %56 = arith.addf %54, %55 : vector<1x256xf32>
    %57 = math.log %56 : vector<1x256xf32>
    %cst_39 = arith.constant 1.000000e+00 : f32
    %58 = vector.broadcast %cst_39 : f32 to vector<1x256xf32>
    %59 = arith.subf %58, %56 : vector<1x256xf32>
    %60 = arith.mulf %59, %59 : vector<1x256xf32>
    %cst_40 = arith.constant 0.000000e+00 : f32
    %61 = vector.broadcast %cst_40 : f32 to vector<1x256xf32>
    %62 = arith.subf %61, %60 : vector<1x256xf32>
    %63 = arith.mulf %62, %57 : vector<1x256xf32>
    %c0_41 = arith.constant 0 : index
    %c0_42 = arith.constant 0 : index
    %c0_43 = arith.constant 0 : index
    %c0_44 = arith.constant 0 : index
    %64 = vector.load %arg8[%c0_41, %c0_42, %c0_43, %c0_44] : memref<1x1x1x1xf32, #tpu.memory_space<vmem>>, vector<1x1x1x1xf32>
    %65 = vector.shape_cast %64 : vector<1x1x1x1xf32> to vector<1x1xf32>
    %cst_45 = arith.constant dense<0.000000e+00> : vector<1xf32>
    %66 = vector.multi_reduction <add>, %63, %cst_45 [1] : vector<1x256xf32> to vector<1xf32>
    %67 = vector.shape_cast %66 : vector<1xf32> to vector<1x1xf32>
    %68 = arith.addf %65, %67 : vector<1x1xf32>
    %c0_46 = arith.constant 0 : index
    %c0_47 = arith.constant 0 : index
    %c0_48 = arith.constant 0 : index
    %c0_49 = arith.constant 0 : index
    %69 = vector.load %arg8[%c0_46, %c0_47, %c0_48, %c0_49] : memref<1x1x1x1xf32, #tpu.memory_space<vmem>>, vector<1x1x1x1xf32>
    %70 = vector.shape_cast %69 : vector<1x1x1x1xf32> to vector<1x1xf32>
    %71 = vector.shape_cast %68 : vector<1x1xf32> to vector<1x1x1x1xf32>
    tpu.vector_store %arg8[%c0_46, %c0_47, %c0_48, %c0_49], %71 {strides = array<i32>} : memref<1x1x1x1xf32, #tpu.memory_space<vmem>>, vector<1x1x1x1xf32>,
    return
  }
  func.func @transform_0(%arg0: i32, %arg1: i32, %arg2: i32) -> (i32, i32, i32) {
    %c1_i32 = arith.constant 1 : i32
    %0 = arith.muli %arg1, %c1_i32 : i32
    %1 = arith.addi %0, %arg2 : i32
    %c0_i32 = arith.constant 0 : i32
    %2 = arith.minsi %1, %c0_i32 : i32
    %c0_i32_0 = arith.constant 0 : i32
    %c0_i32_1 = arith.constant 0 : i32
    return %arg0, %c0_i32_0, %2 : i32, i32, i32
  }
  func.func @transform_1(%arg0: i32, %arg1: i32, %arg2: i32) -> (i32, i32, i32) {
    %c1_i32 = arith.constant 1 : i32
    %0 = arith.muli %arg1, %c1_i32 : i32
    %1 = arith.addi %0, %arg2 : i32
    %c0_i32 = arith.constant 0 : i32
    %2 = arith.minsi %1, %c0_i32 : i32
    %c0_i32_0 = arith.constant 0 : i32
    %c0_i32_1 = arith.constant 0 : i32
    return %arg0, %c0_i32_0, %2 : i32, i32, i32
  }
  func.func @transform_2(%arg0: i32, %arg1: i32, %arg2: i32) -> (i32, i32, i32, i32) {
    %c0_i32 = arith.constant 0 : i32
    %c0_i32_0 = arith.constant 0 : i32
    %c0_i32_1 = arith.constant 0 : i32
    return %arg0, %arg1, %c0_i32, %c0_i32_0 : i32, i32, i32, i32
  }
  func.func @transform_3(%arg0: i32, %arg1: i32, %arg2: i32) -> (i32, i32, i32, i32) {
    %c0_i32 = arith.constant 0 : i32
    %c0_i32_0 = arith.constant 0 : i32
    %c0_i32_1 = arith.constant 0 : i32
    return %arg0, %arg1, %c0_i32, %c0_i32_0 : i32, i32, i32, i32
  }
  func.func @transform_4(%arg0: i32, %arg1: i32, %arg2: i32) -> (i32, i32, i32, i32) {
    %c0_i32 = arith.constant 0 : i32
    %c0_i32_0 = arith.constant 0 : i32
    %c0_i32_1 = arith.constant 0 : i32
    return %arg0, %arg1, %c0_i32, %c0_i32_0 : i32, i32, i32, i32
  }
  func.func @transform_5(%arg0: i32, %arg1: i32, %arg2: i32) -> (i32, i32, i32, i32) {
    %c0_i32 = arith.constant 0 : i32
    %c0_i32_0 = arith.constant 0 : i32
    %c0_i32_1 = arith.constant 0 : i32
    return %arg0, %arg1, %c0_i32, %c0_i32_0 : i32, i32, i32, i32
  }
}

</mosaic_0001>

<bundles_post_ra>
// kernel: tpu_custom_call.1
= control target key start
LH: loop header
LB: loop body
LE: loop exit
PB: predicated region body
PF: predicated region fallthrough
CT: control target
= control target key end

     0   :  { %11 = vsyncpa [#allocation3], 0  ;;  %s1145_s0 = inlined_call_operand.hbm [shape: f32[2,4,256], index: 0, kind: input, shape index: {}]   ;;  %s1146_s1 = inlined_call_operand.vmem [shape: s8[2,1,256], index: 1, kind: input, shape index: {}]   ;;  %s1147_s2 = inlined_call_operand.vmem [shape: f32[2,1,4,1], index: 2, kind: output, shape index: {0}]   ;;  %s1148_s3 = inlined_call_operand.vmem [shape: f32[2,1,4,1], index: 3, kind: output, shape index: {1}]   ;;  %s1149_s4 = inlined_call_operand.vmem [shape: f32[2,1,4,1], index: 4, kind: output, shape index: {2}]   ;;  %s1150_s5 = inlined_call_operand.vmem [shape: f32[2,1,1,1], index: 5, kind: output, shape index: {3}]  }
   0x1   :  { %13 = vsyncpa [#allocation3 + $0x1], 0  ;;  %s963_s18 = smov 0   ;;  %s965_s19 = smov 0  }
   0x2   :  { %s967_s20 = smov 0   ;;  %s969_s21 = smov 0  }
   0x3   :  { %s971_s22 = smov 0   ;;  %s973_s23 = smov 0  }
   0x4 LB: > { %s766_s24 = sadd.s32 4294967295, %s929_s23   ;;  %s38_s25 = sadd.s32 1, %s925_s22  ;;  %s929_s23 = sphi %s973_s23, %s19_s23   ;;  %s925_s22 = sphi %s971_s22, %s1162_s22   ;;  %s921_s21 = sphi %s969_s21, %s1161_s21   ;;  %s917_s20 = sphi %s967_s20, %s1160_s20   ;;  %s913_s19 = sphi %s965_s19, %s1159_s19   ;;  %s909_s18 = sphi %s963_s18, %s1158_s18  }
   0x5   : > { %p40_p0 = scmp.ge.s32.totalorder %s38_s25, 2  ;;  %s53_s26 = sadd.s32 1, %s917_s20 }
   0x6   : > { %p60_p1 = scmp.ne.s32.totalorder %s917_s20, %s913_s19  ;;  %p61_p2 = scmp.eq.s32.totalorder %s929_s23, 0 }
   0x7   : > { %s1164_s25 = smov (%p40_p0, %s38_s25), 0  ;;  %p66_p4 = scmp.ne.s32.totalorder %s913_s19, %s909_s18 }
   0x8   : > { %p999_p3 = por %p61_p2, %p60_p1  ;;  %s48_s28 = ssub.s32 %s925_s22, %s1164_s25 }
   0x9   : > { %p67_p5 = scmp.eq.s32.totalorder %s766_s24, 0  ;;  %p51_p6 = scmp.eq.s32.totalorder %s48_s28, 0 }
   0xa   : > { %p790_p8 = scmp.lt.s32.totalorder %s929_s23, 2  ;;  %s236_s6 = sand.u32 1, %s917_s20  }
   0xb   : > { %p1006_p7 = por %p67_p5, %p66_p4  ;;  %s783_s7 = sshll.u32 %s925_s22, 7 }
   0xc   : > { %s1012_s30 = scalar_select %p51_p6, %s917_s20, %s53_s26  }
   0xd   : > { %s770_s8 = sshll.u32 %s236_s6, 3  ;;  %s251_s11 = scalar_lea.hbm %s1145_s0, %s783_s7 }
   0xe   : > { %s240_s12 = scalar_lea.vmem [#allocation2], %s770_s8  ;;  %p1021_p9 = pnand %p790_p8, %p999_p3 }
   0xf   : > { %s253_s13 = sshll.u32 %s240_s12, 4  ;;  %p773_p10 = scmp.ge.s32.totalorder %s929_s23, 1  ;;  %s254_s13 = int_to_ptr.vmem [resolvable:$true] %s253_s13 }
  0x10   : > { %p276_p11 = scmp.lt.s32.totalorder %s929_s23, 3  ;;  %s237_s15 = scalar_lea.sflag [#allocation3], %s236_s6 }
  0x11   : > { %p853_p12 = pneg %p1021_p9  ;;  %s864_s16 = scalar_lea.vmem %s254_s13, 128 }
  0x12   : > { %p865_p13 = scmp.ne.s32.totalorder %s254_s13, %s864_s16  ;;  %s931_s17 = smov [#allocation2]  }
  0x13   : > { %s869_s18 = sshll.u32 %s931_s17, 4  ;;  %s870_s18 = int_to_ptr.vmem [resolvable:$false] %s869_s18 }
  0x14   : > { %p867_p0 = pnand %p865_p13, %p853_p12  ;;  %s871_s24 = scalar_lea.vmem %s870_s18, 256 }
  0x15   : > { %p872_p2 = scmp.lt.s32.totalorder %s254_s13, %s870_s18  ;;  %p873_p3 = scmp.lt.s32.totalorder %s871_s24, %s864_s16 }
  0x16   : > { %p868_p1 = pneg %p867_p0 }
  0x17   : > { %p874_p4 = por %p873_p3, %p872_p2 }
  0x19   : > { %p875_p5 = pnand %p874_p4, %p868_p1 }
  0x1b   : > { %878 = shalt.err (!%p875_p5)
}
  0x1c   : > { %789 = dma.hbm_to_vmem [thread:$0]  (!%p1021_p9), %s251_s11, 128, %s254_s13, %s237_s15  }
  0x1d   : > { %p277_p6 = pnand %p773_p10, %p276_p11 }
  0x1e   : > { %s282_s26 = sand.u32 (!%p277_p6), 1, %s913_s19  }
  0x1f   : > { %280 = sbr.rel (%p277_p6) target bundleno = 289 (0x121), region = 28  ;;  %s774_s27 = sshll.u32 (!%p277_p6), %s282_s26, 3 }
  0x20   : > { %s283_s28 = scalar_lea.sflag (!%p277_p6), [#allocation3], %s282_s26  ;;  %s286_s6 = scalar_lea.vmem (!%p277_p6), [#allocation2], %s774_s27 }
  0x24   : > { %904 = dma.done.wait (%p1006_p7), %s283_s28, 128  }
  0x25   : > { %906 = vsyncadd (%p1006_p7), %s283_s28, 4294967168  ;;  %p354_p8 = scmp.lt.s32.totalorder %s921_s21, 1  ;;  %v454_v0 = vlaneseq  ;;  %vm396_vm0 = vcmask 3072   ;;  %vm408_vm1 = vcmask 1043456   ;;  %v932_v4 = vmov 0.0   ;;  %v402_v6 = vld [vmem:[%s286_s6] sm:$0xff] }
  0x26   : > { %v406_v8 = vcombine.high %v402_v6, %v402_v6  ;;  %v409_v9 = vsel %vm408_vm1, %v402_v6, -inf  ;;  %vm400_vm4 = vcmask 0  }
  0x27   : > { %s1166_s21 = smov (!%p354_p8, %s921_s21), 1  ;;  %v455_v1 = vshrl.u32 %v454_v0, 7  ;;  %v410_v10 = vrot.slane %v409_v9, 4 }
  0x28   : > { %s775_s7 = sshll.u32 %s1166_s21, 1  ;;  %s1046_s8 = sshll.u32 %s1166_s21, 2  ;;  %v416_v13 = vsel %vm408_vm1, %v406_v8, -inf }
  0x29   : > { %s360_s11 = scalar_lea.vmem %s1146_s1, %s775_s7  ;;  %s1055_s13 = scalar_lea.vmem %s1149_s4, %s1046_s8  ;;  %v458_v2 = vsub.s32 0, %v455_v1  ;;  %v462_v3 = vsub.s32 4, %v455_v1  ;;  %v411_v14 = vmax.f32 %v409_v9, %v410_v10  ;;  %v417_v15 = vrot.slane %v416_v13, 4 }
  0x2a   : > { %399 = vst.msk [vmem:[%s1055_s13] sm:$0xf] %vm396_vm0, %v932_v4  ;;  %v403_v5 = vld [vmem:[%s360_s11] sm:$0x3]  ;;  %s1082_s16 = scalar_lea.vmem %s1147_s2, %s1046_s8  ;;  %s1101_s24 = scalar_lea.vmem %s1148_s3, %s1046_s8 }
  0x2b   : > { %v404_v7 = vunpack.c.0.s8 %v403_v5  ;;  %v412_v18 = vrot.slane %v411_v14, 2  ;;  %v418_v19 = vmax.f32 %v416_v13, %v417_v15  ;;  %397 = vst.msk [vmem:[%s1082_s16] sm:$0xf] %vm396_vm0, %v932_v4  ;;  %398 = vst.msk [vmem:[%s1101_s24] sm:$0xf] %vm396_vm0, %v932_v4  ;;  %s1110_s28 = scalar_lea.vmem %s1150_s5, %s1166_s21 }
  0x2c   : > { %401 = vst.msk [vmem:[%s1110_s28] sm:$0x1] %vm400_vm4, %v932_v4 }
  0x2d   : > { %v459_v11 = vrot.slane %v404_v7, %v458_v2  ;;  %v463_v12 = vrot.slane %v404_v7, %v462_v3  ;;  %v413_v24 = vmax.f32 %v411_v14, %v412_v18  ;;  %v419_v25 = vrot.slane %v418_v19, 2 }
  0x2f   : > { %v467_v16 = vrot.slane %v459_v11, %v458_v2  ;;  %v471_v17 = vrot.slane %v463_v12, %v458_v2  ;;  %v414_v29 = vrot.slane %v413_v24, 1  ;;  %v420_v30 = vmax.f32 %v418_v19, %v419_v25 }
  0x31   : > { %vm1062_vm2 = vcmp.eq.s32.totalorder %v455_v1, %v467_v16  ;;  %vm1066_vm3 = vcmp.eq.s32.totalorder %v455_v1, %v471_v17  ;;  %v415_v31 = vmax.f32 %v413_v24, %v414_v29  ;;  %v421_v32 = vrot.slane %v420_v30, 1 }
  0x32   : > { %v779_v22 = vsel %vm1062_vm2, 1.0, %v932_v4  ;;  %v780_v23 = vsel %vm1066_vm3, 1.0, %v932_v4  ;;  %v508_v4 = vld [vmem:[%s1055_s13] sm:$0xf] }
  0x33   : > { %v513_v26 = vsel %vm408_vm1, %v779_v22, 0.0  ;;  %v514_v27 = vsel %vm408_vm1, %v780_v23, 0.0  ;;  %v422_v33 = vmax.f32 %v420_v30, %v421_v32 }
  0x34   : > { %v515_v28 = vadd.f32 %v514_v27, %v513_v26 }
  0x35   : > { %v425_v34 = vcombine.low %v415_v31, %v422_v33 }
  0x36   : > { %516 = vadd.xlane.f32.xlu1 %v515_v28 }
  0x37   : > { %v427_v35 = vsub.f32 %v402_v6, %v425_v34 }
  0x39   : > { %v428_v36 = vmul.f32 1.442695, %v427_v35 }
  0x3b   : > { %841 = vpow2.f32 %v428_v36  ;;  %v493_v36 = vld [vmem:[%s1082_s16] sm:$0xf] }
  0x48   : > { %v842_v37 = vpop.eup %841 }
  0x49   : > { %v431_v38 = vcombine.high %v842_v37, %v842_v37  ;;  %v433_v39 = vsel %vm408_vm1, %v842_v37, 0.0 }
  0x4a   : > { %v434_v40 = vrot.slane %v433_v39, 4 }
  0x4b   : > { %v440_v41 = vsel %vm408_vm1, %v431_v38, 0.0 }
  0x4c   : > { %v435_v42 = vadd.f32 %v434_v40, %v433_v39  ;;  %v441_v43 = vrot.slane %v440_v41, 4  ;;  %v500_v39 = vld [vmem:[%s1101_s24] sm:$0xf] }
  0x4e   : > { %v436_v44 = vrot.slane %v435_v42, 2  ;;  %v442_v45 = vadd.f32 %v441_v43, %v440_v41 }
  0x50   : > { %v437_v46 = vadd.f32 %v436_v44, %v435_v42  ;;  %v443_v47 = vrot.slane %v442_v45, 2  ;;  %v538_v42 = vld [vmem:[%s1110_s28] sm:$0x1] }
  0x52   : > { %v438_v48 = vrot.slane %v437_v46, 1  ;;  %v444_v49 = vadd.f32 %v443_v47, %v442_v45 }
  0x54   : > { %v439_v50 = vadd.f32 %v438_v48, %v437_v46  ;;  %v445_v51 = vrot.slane %v444_v49, 1 }
  0x56   : > { %v446_v52 = vadd.f32 %v445_v51, %v444_v49  ;;  %843 = vrcp.f32 %v439_v50 }
  0x58   : > { %845 = vrcp.f32 %v446_v52 }
  0x63   : > { %v844_v53 = vpop.eup %843 }
  0x65   : > { %v846_v54 = vpop.eup %845 }
  0x66   : > { %v451_v55 = vcombine.low %v844_v53, %v846_v54 }
  0x68   : > { %v453_v56 = vmul.f32 %v842_v37, %v451_v55 }
  0x6a   : > { %v475_v57 = vcombine.high %v453_v56, %v453_v56  ;;  %v477_v58 = vsel %vm1062_vm2, %v453_v56, 0.0  ;;  %v501_v63 = vsel %vm408_vm1, %v453_v56, 0.0 }
  0x6b   : > { %v479_v59 = vsel %vm408_vm1, %v477_v58, 0.0 }
  0x6c   : > { %v478_v60 = vsel %vm1066_vm3, %v475_v57, 0.0  ;;  %v480_v61 = vrot.slane %v479_v59, 4  ;;  %v502_v0 = vsel %vm408_vm1, %v475_v57, 0.0 }
  0x6d   : > { %v486_v62 = vsel %vm408_vm1, %v478_v60, 0.0  ;;  %v503_v7 = vadd.f32 %v502_v0, %v501_v63 }
  0x6e   : > { %v481_v1 = vadd.f32 %v480_v61, %v479_v59  ;;  %v494_v2 = vadd.f32 %v486_v62, %v479_v59  ;;  %v487_v3 = vrot.slane %v486_v62, 4 }
  0x70   : > { %v482_v5 = vrot.slane %v481_v1, 2  ;;  %495 = vadd.xlane.f32.xlu0 %v494_v2  ;;  %v488_v6 = vadd.f32 %v487_v3, %v486_v62 }
  0x72   : > { %v483_v8 = vadd.f32 %v482_v5, %v481_v1  ;;  %v489_v9 = vrot.slane %v488_v6, 2 }
  0x74   : > { %v484_v10 = vrot.slane %v483_v8, 1  ;;  %v490_v11 = vadd.f32 %v489_v9, %v488_v6  ;;  %504 = vadd.xlane.f32.xlu0 %v503_v7 }
  0x76   : > { %v485_v12 = vadd.f32 %v484_v10, %v483_v8  ;;  %v491_v13 = vrot.slane %v490_v11, 1 }
  0x78   : > { %v520_v14 = vmul.f32 0.99998665, %v485_v12  ;;  %v492_v15 = vadd.f32 %v491_v13, %v490_v11 }
  0x7a   : > { %v521_v16 = vmul.f32 0.99998665, %v492_v15  ;;  %v522_v17 = vadd.f32 3.3333333e-06, %v520_v14 }
  0x7c   : > { %v523_v18 = vadd.f32 3.3333333e-06, %v521_v16  ;;  %v524_v19 = vadd.f32 1e-05, %v522_v17 }
  0x7e   : > { %v525_v20 = vadd.f32 1e-05, %v523_v18  ;;  %847 = vlog2.f32 %v524_v19  ;;  %v530_v21 = vsub.f32 1.0, %v524_v19 }
  0x80   : > { %849 = vlog2.f32 %v525_v20  ;;  %v531_v22 = vsub.f32 1.0, %v525_v20  ;;  %v532_v23 = vmul.f32 %v530_v21, %v530_v21 }
  0x82   : > { %v533_v24 = vmul.f32 %v531_v22, %v531_v22  ;;  %v534_v25 = vsub.f32 0.0, %v532_v23 }
  0x84   : > { %v535_v28 = vsub.f32 0.0, %v533_v24 }
  0x8b   : > { %v848_v26 = vpop.eup %847 }
  0x8c   : > { %v527_v27 = vmul.f32 0.6931472, %v848_v26 }
  0x8d   : > { %v850_v29 = vpop.eup %849 }
  0x8e   : > { %v529_v30 = vmul.f32 0.6931472, %v850_v29  ;;  %v536_v31 = vmul.f32 %v534_v25, %v527_v27 }
  0x90   : > { %v537_v32 = vmul.f32 %v535_v28, %v529_v30 }
  0x92   : > { %v539_v33 = vadd.f32 %v537_v32, %v536_v31 }
  0x94   : > { %540 = vadd.xlane.f32.xlu1 %v539_v33 }
  0xbf   : > { %v517_v34 = vpop.xlane.xlu1 %516 }
  0xc0   : > { %v518_v35 = vadd.f32 %v517_v34, %v508_v4 }
  0xc2   : > { %519 = vst.msk [vmem:[%s1055_s13] sm:$0xf] %vm396_vm0, %v518_v35 }
  0xf9   : > { %v496_v37 = vpop.xlane.xlu0 %495 }
  0xfa   : > { %v497_v38 = vadd.f32 %v496_v37, %v493_v36 }
  0xfc   : > { %499 = vst.msk [vmem:[%s1082_s16] sm:$0xf] %vm396_vm0, %v497_v38 }
  0xfd   : > { %v505_v40 = vpop.xlane.xlu0 %504 }
  0xfe   : > { %v506_v41 = vadd.f32 %v505_v40, %v500_v39 }
 0x100   : > { %507 = vst.msk [vmem:[%s1101_s24] sm:$0xf] %vm396_vm0, %v506_v41 }
 0x11d   : > { %v541_v43 = vpop.xlane.xlu1 %540 }
 0x11e   : > { %v542_v44 = vadd.f32 %v541_v43, %v538_v42 }
 0x120   : > { %544 = vst.msk [vmem:[%s1110_s28] sm:$0x1] %vm400_vm4, %v542_v44 }
 0x121 PF: > { %s19_s23 = sadd.s32 1, %s929_s23   ;;  %s1158_s18 = smov %s913_s19 }
 0x122   : > { %p16_p7 = scmp.ge.s32.totalorder %s19_s23, 4   ;;  %s1159_s19 = smov %s917_s20 }
 0x123   : > { %s1160_s20 = smov %s1012_s30  ;;  %s1161_s21 = smov %s925_s22 }
 0x124   : > { %s1162_s22 = smov %s1164_s25  ;;  %18 = sbr.rel (!%p16_p7) target bundleno = 4 (0x4), region = 111 }
 0x129   :  { %628 = vsyncpa [#allocation3], 1 }
 0x12a   :  { %630 = vsyncpa [#allocation3 + $0x1], 1 }

</bundles_post_ra>
